<compile_context>
chip_gen: v7x
topology: tpu7x:2x2x1
jax: 0.10.0
libtpu: 0.0.40
codegen_flags: <defaults>
</compile_context>

<pallas_src>
import functools

import jax
import jax.numpy as jnp
import numpy as np
from jax.experimental import pallas as pl
from jax.experimental.pallas import tpu as pltpu

GAMMA = 2.0   # static; gamma == 2 is lowered as a plain square (no pow / log)
ALPHA = 0.25


def _round_up(x, m):
    return ((x + m - 1) // m) * m


def _vmem_capacity_bytes():
    """Physical VMEM per TensorCore; 64 MiB fallback (= v7x, the smallest)."""
    try:
        info = pltpu.get_tpu_info()
        cap = int(getattr(info, "vmem_capacity_bytes", 0) or 0)
        if cap > 0:
            return cap
    except Exception:
        pass
    return 64 * 1024 * 1024


def _focal_loss_kernel(n_valid, tile_n, needs_mask, use_mxu,
                       logits_ref, tgt_ref, out_ref):
    """One grid step: tile_n rows -> one lane-dense (1, 128) partial sum."""
    i = pl.program_id(0)

    x = logits_ref[...].astype(jnp.float32)              # (tile_n, C) f32 compute
    t = tgt_ref[...]                                      # (tile_n, 1) int32
    c = x.shape[-1]

    # Row max is the only reduction kept on the XLU.
    m = jnp.max(x, axis=-1, keepdims=True)                # (tile_n, 1)
    exp_xm = jnp.exp(x - m)                               # EUP: one exp / element

    # One-hot select of the target logit (VPU compare + select).
    # TODO(synk): no ignore_index / out-of-range target handling (matches the
    # module; out-of-range targets are undefined in torch's cross_entropy too).
    cls_iota = jax.lax.broadcasted_iota(jnp.int32, x.shape, 1)
    sel = jnp.where(cls_iota == t, x, 0.0)                # (tile_n, C)

    if use_mxu:
        # Small/medium C: the kernel is XLU-bound (v6e/v7x have only 2 XLU
        # ports), so push these two lane reductions onto the idle MXU.
        ones_cx = jnp.ones((c, 128), jnp.float32)
        sum_exp = jnp.dot(exp_xm, ones_cx,
                          preferred_element_type=jnp.float32)[:, :1]
        tgt_logit = jnp.dot(sel, ones_cx,
                            preferred_element_type=jnp.float32)[:, :1]
    else:
        # Large C: HBM-bound anyway; avoid the (C, 128) ones constant.
        sum_exp = jnp.sum(exp_xm, axis=-1, keepdims=True)
        tgt_logit = jnp.sum(sel, axis=-1, keepdims=True)

    lse = m + jnp.log(sum_exp)                            # (tile_n, 1)
    ce = lse - tgt_logit                                  # per-row cross-entropy
    pt = jnp.exp(-ce)
    one_minus_pt = 1.0 - pt
    # gamma == 2.0 (static) -> plain VPU square instead of pow == exp(g*log(x)).
    focal = ALPHA * (one_minus_pt * one_minus_pt) * ce    # (tile_n, 1)

    partial = jnp.sum(focal)                              # sublane reduce

    if not needs_mask:
        # N divisible by tile_n: no padded rows anywhere, no mask at all.
        out_ref[...] = jnp.broadcast_to(partial, (1, 128))
    else:
        last = pl.num_programs(0) - 1

        @pl.when(i != last)
        def _():
            out_ref[...] = jnp.broadcast_to(partial, (1, 128))

        @pl.when(i == last)
        def _():
            # Only the last tile contains padded rows; mask them there.
            row = i * tile_n + jax.lax.broadcasted_iota(
                jnp.int32, (tile_n, 1), 0)
            masked = jnp.where(row < n_valid, focal, 0.0)
            out_ref[...] = jnp.broadcast_to(jnp.sum(masked), (1, 128))


def focal_loss(logits, targets, *, tile_n=None, vmem_limit_bytes=None):
    """logits: (N, C) f32 or bf16; targets: (N,) int.  Returns scalar f32."""
    n, c = logits.shape
    c_pad = max(128, _round_up(c, 128))                   # lane padding in VMEM
    itemsize = jnp.dtype(logits.dtype).itemsize

    vmem_cap = _vmem_capacity_bytes()
    if vmem_limit_bytes is None:
        # <= ~48 MiB on v7x (64 MiB / TC), <= ~96 MiB on v5e/v6e (128 MiB).
        vmem_limit_bytes = int(min(0.75 * vmem_cap, 96 * 1024 * 1024))

    use_mxu = c <= 1024
    ones_bytes = c * 128 * 4 if use_mxu else 0

    if tile_n is None:
        # Real per-step VMEM working set, per tile row:
        per_row = (2 * c_pad * itemsize    # double-buffered logits tile
                   + 2 * 128 * 4           # double-buffered lane-padded (tile_n,1) targets
                   + 3 * c_pad * 4)        # f32 temps: x upcast, exp(x-m), one-hot select
        budget = int(0.8 * vmem_limit_bytes) - ones_bytes - (1 << 20)
        tile_n = max(8, budget // per_row)
        # Bound the strided targets DMA (4 B per destination row per step) while
        # still moving >= ~1-3 us of logits traffic per step on every chip.
        # TODO(synk): a lane-dense (num_tiles, tile_n) targets layout would
        # remove this cap, but needs an in-kernel lane->sublane relayout.
        tile_n = min(tile_n, 8192)
        tile_n = min(tile_n, _round_up(n, 8))
        if n >= 8192:
            # Keep both v7x TensorCores busy under dimension_semantics="parallel":
            # ensure ~4+ grid steps once N is large enough to afford them.
            tile_n = min(tile_n, _round_up(pl.cdiv(n, 4), 8))
        tile_n = max(8, (tile_n // 8) * 8)                # sublane-aligned

    num_tiles = pl.cdiv(n, tile_n)
    padded_n = num_tiles * tile_n
    needs_mask = padded_n != n

    if needs_mask:                                        # ragged N: pad + mask
        logits_p = jnp.pad(logits, ((0, padded_n - n), (0, 0)))
        targets_p = jnp.pad(targets, (0, padded_n - n))
    else:
        logits_p, targets_p = logits, targets
    tgt2d = targets_p.astype(jnp.int32).reshape(padded_n, 1)

    # NOTE: n / tile_n are baked in statically; padded shapes change with N
    # anyway, so scalar-prefetching n_valid would not avoid recompiles here.
    partials = pl.pallas_call(
        functools.partial(_focal_loss_kernel, n, tile_n, needs_mask, use_mxu),
        out_shape=jax.ShapeDtypeStruct((num_tiles, 128), jnp.float32),
        grid_spec=pltpu.PrefetchScalarGridSpec(
            num_scalar_prefetch=0,
            grid=(num_tiles,),
            in_specs=[
                pl.BlockSpec((tile_n, c), lambda i: (i, 0)),
                pl.BlockSpec((tile_n, 1), lambda i: (i, 0)),
            ],
            out_specs=pl.BlockSpec((1, 128), lambda i: (i, 0)),
        ),
        compiler_params=pltpu.CompilerParams(
            dimension_semantics=("parallel",),            # shard steps across TCs
            vmem_limit_bytes=int(vmem_limit_bytes),
        ),
    )(logits_p, tgt2d)

    # Final cross-tile reduce + mean in the wrapper (num_tiles scalars).
    return (jnp.sum(partials[:, 0]) / n).astype(jnp.float32)


def focal_loss_ref(logits, targets):
    """Pure-JAX reference mirroring the PyTorch module."""
    logp = jax.nn.log_softmax(logits.astype(jnp.float32), axis=-1)
    ce = -jnp.take_along_axis(logp, targets[:, None].astype(jnp.int32),
                              axis=-1)[:, 0]
    pt = jnp.exp(-ce)
    return jnp.mean(ALPHA * (1.0 - pt) ** GAMMA * ce)


if __name__ == "__main__":
    key = jax.random.PRNGKey(0)
    k1, k2, k3, k4 = jax.random.split(key, 4)

    # Divisible case.
    N, C = 128, 16
    logits = jax.random.normal(k1, (N, C), dtype=jnp.float32)
    targets = jax.random.randint(k2, (N,), 0, C, dtype=jnp.int32)
    out = jax.block_until_ready(focal_loss(logits, targets))
    ref = jax.block_until_ready(focal_loss_ref(logits, targets))
    np.testing.assert_allclose(np.asarray(out), np.asarray(ref),
                               rtol=1e-5, atol=1e-6)

    # Ragged case (N not a multiple of the tile): exercises last-step masking.
    N2, C2 = 100, 10
    logits2 = jax.random.normal(k3, (N2, C2), dtype=jnp.float32)
    targets2 = jax.random.randint(k4, (N2,), 0, C2, dtype=jnp.int32)
    out2 = jax.block_until_ready(focal_loss(logits2, targets2))
    ref2 = jax.block_until_ready(focal_loss_ref(logits2, targets2))
    np.testing.assert_allclose(np.asarray(out2), np.asarray(ref2),
                               rtol=1e-5, atol=1e-6)

    print("KERNEL_OK")
</pallas_src>

<mosaic_0001>
module attributes {stable_mosaic.version = 11 : i64} {
  func.func @_focal_loss_kernel(%arg0: i32, %arg1: memref<128x16xf32, #tpu.memory_space<vmem>>, %arg2: memref<128x1xi32, #tpu.memory_space<vmem>>, %arg3: memref<1x128xf32, #tpu.memory_space<vmem>>) attributes {dimension_semantics = [#tpu.dimension_semantics<parallel>], iteration_bounds = array<i64: 1>, scalar_prefetch = 0 : i64, scratch_operands = 0 : i64, tpu.core_type = #tpu.core_type<tc>, window_params = [{transform_indices = @transform_0, window_bounds = array<i64: 128, 16>}, {transform_indices = @transform_1, window_bounds = array<i64: 128, 1>}, {transform_indices = @transform_2, window_bounds = array<i64: 1, 128>}]} {
    %c0 = arith.constant 0 : index
    %c0_0 = arith.constant 0 : index
    %0 = vector.load %arg1[%c0, %c0_0] : memref<128x16xf32, #tpu.memory_space<vmem>>, vector<128x16xf32>
    %c0_1 = arith.constant 0 : index
    %c0_2 = arith.constant 0 : index
    %1 = vector.load %arg2[%c0_1, %c0_2] : memref<128x1xi32, #tpu.memory_space<vmem>>, vector<128x1xi32>
    %cst = arith.constant dense<0xFF800000> : vector<128xf32>
    %2 = vector.multi_reduction <maximumf>, %0, %cst [1] : vector<128x16xf32> to vector<128xf32>
    %3 = vector.shape_cast %2 : vector<128xf32> to vector<128x1xf32>
    %4 = vector.broadcast %3 : vector<128x1xf32> to vector<128x16xf32>
    %5 = arith.subf %0, %4 : vector<128x16xf32>
    %6 = math.exp %5 : vector<128x16xf32>
    %7 = tpu.iota {dimensions = array<i32: 1>} : vector<128x16xi32>
    %8 = vector.broadcast %1 : vector<128x1xi32> to vector<128x16xi32>
    %9 = arith.cmpi eq, %7, %8 : vector<128x16xi32>
    %cst_3 = arith.constant 0.000000e+00 : f32
    %10 = vector.broadcast %cst_3 : f32 to vector<128x16xf32>
    %11 = arith.select %9, %0, %10 : vector<128x16xi1>, vector<128x16xf32>
    %cst_4 = arith.constant 1.000000e+00 : f32
    %12 = vector.broadcast %cst_4 : f32 to vector<16x128xf32>
    %cst_5 = arith.constant dense<0.000000e+00> : vector<128x128xf32>
    %13 = tpu.matmul %6, %12, %cst_5 {dimension_numbers = #tpu.dot_dimension_numbers<[1], [0], [0], [1], [0, 0, 1, 1], [], []>} : vector<128x16xf32>, vector<16x128xf32>, vector<128x128xf32> -> vector<128x128xf32>
    %14 = vector.extract_strided_slice %13 {offsets = [0, 0], sizes = [128, 1], strides = [1, 1]} : vector<128x128xf32> to vector<128x1xf32>
    %cst_6 = arith.constant dense<0.000000e+00> : vector<128x128xf32>
    %15 = tpu.matmul %11, %12, %cst_6 {dimension_numbers = #tpu.dot_dimension_numbers<[1], [0], [0], [1], [0, 0, 1, 1], [], []>} : vector<128x16xf32>, vector<16x128xf32>, vector<128x128xf32> -> vector<128x128xf32>
    %16 = vector.extract_strided_slice %15 {offsets = [0, 0], sizes = [128, 1], strides = [1, 1]} : vector<128x128xf32> to vector<128x1xf32>
    %17 = math.log %14 : vector<128x1xf32>
    %18 = arith.addf %3, %17 : vector<128x1xf32>
    %19 = arith.subf %18, %16 : vector<128x1xf32>
    %cst_7 = arith.constant 0.000000e+00 : f32
    %20 = vector.broadcast %cst_7 : f32 to vector<128x1xf32>
    %21 = arith.subf %20, %19 : vector<128x1xf32>
    %22 = math.exp %21 : vector<128x1xf32>
    %cst_8 = arith.constant 1.000000e+00 : f32
    %23 = vector.broadcast %cst_8 : f32 to vector<128x1xf32>
    %24 = arith.subf %23, %22 : vector<128x1xf32>
    %25 = arith.mulf %24, %24 : vector<128x1xf32>
    %cst_9 = arith.constant 2.500000e-01 : f32
    %26 = vector.broadcast %cst_9 : f32 to vector<128x1xf32>
    %27 = arith.mulf %26, %25 : vector<128x1xf32>
    %28 = arith.mulf %27, %19 : vector<128x1xf32>
    %29 = vector.shape_cast %28 : vector<128x1xf32> to vector<1x128x1xf32>
    %cst_10 = arith.constant dense<0.000000e+00> : vector<1xf32>
    %30 = vector.multi_reduction <add>, %29, %cst_10 [1, 2] : vector<1x128x1xf32> to vector<1xf32>
    %31 = vector.shape_cast %30 : vector<1xf32> to vector<1x1x1xf32>
    %32 = vector.extract %31[0, 0, 0] : f32 from vector<1x1x1xf32>
    %33 = vector.broadcast %32 : f32 to vector<1x128xf32>
    %c0_11 = arith.constant 0 : index
    %c0_12 = arith.constant 0 : index
    %34 = vector.load %arg3[%c0_11, %c0_12] : memref<1x128xf32, #tpu.memory_space<vmem>>, vector<1x128xf32>
    tpu.vector_store %arg3[%c0_11, %c0_12], %33 {strides = array<i32>} : memref<1x128xf32, #tpu.memory_space<vmem>>, vector<1x128xf32>,
    return
  }
  func.func @transform_0(%arg0: i32) -> (i32, i32) {
    %c0_i32 = arith.constant 0 : i32
    %c0_i32_0 = arith.constant 0 : i32
    return %arg0, %c0_i32 : i32, i32
  }
  func.func @transform_1(%arg0: i32) -> (i32, i32) {
    %c0_i32 = arith.constant 0 : i32
    %c0_i32_0 = arith.constant 0 : i32
    return %arg0, %c0_i32 : i32, i32
  }
  func.func @transform_2(%arg0: i32) -> (i32, i32) {
    %c0_i32 = arith.constant 0 : i32
    %c0_i32_0 = arith.constant 0 : i32
    return %arg0, %c0_i32 : i32, i32
  }
}

</mosaic_0001>

<bundles_post_ra>
// kernel: tpu_custom_call.1
= control target key start
LH: loop header
LB: loop body
LE: loop exit
PB: predicated region body
PF: predicated region fallthrough
CT: control target
= control target key end

     0   :  { %vm44_vm0 = vcmask 130048   ;;  %v1097_v6 = vmov 0   ;;  %s1513_s0 = inlined_call_operand.vmem [shape: f32[128,16], index: 0, kind: input, shape index: {}]   ;;  %s1514_s1 = inlined_call_operand.vmem [shape: s32[128,1], index: 1, kind: input, shape index: {}]   ;;  %s1515_s2 = inlined_call_operand.hbm [shape: f32[1,128], index: 2, kind: output, shape index: {}]  }
   0x1   :  { %v1118_v0 = vld [vmem:[%s1513_s0 + $0x10] sm:$0xff]  ;;  %v1123_v1 = vld [vmem:[%s1513_s0] sm:$0xff]  ;;  %v1128_v2 = vld [vmem:[%s1513_s0 + $0x18] sm:$0xff]  ;;  %976 = vset.pattern.permute.xlu1 %v1097_v6  ;;  %975 = vset.pattern.permute.xlu0 %v1097_v6 }
   0x2   :  { %v51_v3 = vsel %vm44_vm0, %v1118_v0, -inf  ;;  %v45_v4 = vsel %vm44_vm0, %v1123_v1, -inf  ;;  %v1137_v5 = vld [vmem:[%s1513_s0 + $0x8] sm:$0xff]  ;;  %v54_v7 = vsel %vm44_vm0, %v1128_v2, -inf  ;;  %v1151_v10 = vld [vmem:[%s1513_s0 + $0x20] sm:$0xff]  ;;  %v1160_v13 = vld [vmem:[%s1513_s0 + $0x38] sm:$0xff] }
   0x3   :  { %52 = vmax.xlane.f32.xlu1 %v51_v3  ;;  %46 = vmax.xlane.f32.xlu0 %v45_v4  ;;  %v48_v8 = vsel %vm44_vm0, %v1137_v5, -inf  ;;  %v1146_v9 = vld [vmem:[%s1513_s0 + $0x28] sm:$0xff]  ;;  %v57_v12 = vsel %vm44_vm0, %v1151_v10, -inf  ;;  %v1165_v14 = vld [vmem:[%s1513_s0 + $0x30] sm:$0xff] }
   0x4   :  { %v60_v11 = vsel %vm44_vm0, %v1146_v9, -inf }
   0x7   :  { %55 = vmax.xlane.f32.xlu1 %v54_v7  ;;  %49 = vmax.xlane.f32.xlu0 %v48_v8 }
   0xb   :  { %61 = vmax.xlane.f32.xlu1 %v60_v11  ;;  %58 = vmax.xlane.f32.xlu0 %v57_v12 }
   0xc   :  { %7 = vsyncpa [#allocation3], 0  ;;  %v66_v15 = vsel %vm44_vm0, %v1160_v13, -inf  ;;  %v63_v16 = vsel %vm44_vm0, %v1165_v14, -inf  ;;  %v1174_v17 = vld [vmem:[%s1513_s0 + $0x48] sm:$0xff]  ;;  %v1179_v18 = vld [vmem:[%s1513_s0 + $0x40] sm:$0xff] }
   0xd   :  { %v72_v19 = vsel %vm44_vm0, %v1174_v17, -inf  ;;  %v69_v20 = vsel %vm44_vm0, %v1179_v18, -inf  ;;  %v1188_v21 = vld [vmem:[%s1513_s0 + $0x58] sm:$0xff]  ;;  %v1193_v22 = vld [vmem:[%s1513_s0 + $0x50] sm:$0xff]  ;;  %v1202_v25 = vld [vmem:[%s1513_s0 + $0x68] sm:$0xff] }
   0xe   :  { %v78_v23 = vsel %vm44_vm0, %v1188_v21, -inf  ;;  %v75_v24 = vsel %vm44_vm0, %v1193_v22, -inf  ;;  %v1207_v26 = vld [vmem:[%s1513_s0 + $0x60] sm:$0xff]  ;;  %v84_v27 = vsel %vm44_vm0, %v1202_v25, -inf  ;;  %v1216_v29 = vld [vmem:[%s1513_s0 + $0x78] sm:$0xff]  ;;  %v1221_v30 = vld [vmem:[%s1513_s0 + $0x70] sm:$0xff] }
   0xf   :  { %67 = vmax.xlane.f32.xlu1 %v66_v15  ;;  %64 = vmax.xlane.f32.xlu0 %v63_v16  ;;  %v81_v28 = vsel %vm44_vm0, %v1207_v26, -inf  ;;  %v90_v31 = vsel %vm44_vm0, %v1216_v29, -inf  ;;  %v87_v32 = vsel %vm44_vm0, %v1221_v30, -inf  ;;  %v1098_v33 = vmov 1.0|1.0   ;;  %v29_v34 = vld [vmem:[%s1514_s1 + $0x8] sm:$0xff] }
  0x10   :  { %966 = vmatprep.subr.bf16.mxu0 %v1098_v33  ;;  %968 = vmatprep.subr.bf16.mxu1 %v1098_v33  ;;  %v30_v35 = vld [vmem:[%s1514_s1 + $0x10] sm:$0xff]  ;;  %v28_v36 = vld [vmem:[%s1514_s1] sm:$0xff]  ;;  %v31_v37 = vld [vmem:[%s1514_s1 + $0x18] sm:$0xff] }
  0x11   :  { %967 = vmatpush3.bf16.msra.mxu0 %v1098_v33  ;;  %969 = vmatpush3.bf16.msra.mxu1 %v1098_v33  ;;  %v37_v38 = vld [vmem:[%s1514_s1 + $0x48] sm:$0xff]  ;;  %v32_v39 = vld [vmem:[%s1514_s1 + $0x20] sm:$0xff]  ;;  %v39_v40 = vld [vmem:[%s1514_s1 + $0x58] sm:$0xff] }
  0x12   :  { %v33_v41 = vld [vmem:[%s1514_s1 + $0x28] sm:$0xff]  ;;  %v34_v43 = vld [vmem:[%s1514_s1 + $0x30] sm:$0xff]  ;;  %v43_v44 = vld [vmem:[%s1514_s1 + $0x78] sm:$0xff] }
  0x13   :  { %73 = vmax.xlane.f32.xlu1 %v72_v19  ;;  %70 = vmax.xlane.f32.xlu0 %v69_v20  ;;  %v41_v42 = vld [vmem:[%s1514_s1 + $0x68] sm:$0xff]  ;;  %v35_v45 = vld [vmem:[%s1514_s1 + $0x38] sm:$0xff]  ;;  %v36_v46 = vld [vmem:[%s1514_s1 + $0x40] sm:$0xff] }
  0x14   :  { %v38_v47 = vld [vmem:[%s1514_s1 + $0x50] sm:$0xff]  ;;  %v40_v48 = vld [vmem:[%s1514_s1 + $0x60] sm:$0xff] }
  0x15   :  { %v42_v49 = vld [vmem:[%s1514_s1 + $0x70] sm:$0xff]  ;;  %s1099_s1 = smov [#allocation2]  }
  0x16   :  { %s834_s15 = sshll.u32 %s1099_s1, 4  ;;  %s835_s15 = int_to_ptr.vmem [resolvable:$true] %s834_s15 }
  0x17   :  { %79 = vmax.xlane.f32.xlu1 %v78_v23  ;;  %76 = vmax.xlane.f32.xlu0 %v75_v24  ;;  %s1073_s17 = scalar_lea.vmem %s835_s15, 16  ;;  %s1077_s18 = scalar_lea.vmem %s835_s15, 32 }
  0x18   :  { %p1074_p0 = scmp.ne.s32.totalorder %s835_s15, %s1073_s17  ;;  %p1078_p1 = scmp.lt.s32.totalorder %s835_s15, %s835_s15 }
  0x19   :  { %p1079_p2 = scmp.lt.s32.totalorder %s1077_s18, %s1073_s17 }
  0x1b   :  { %85 = vmax.xlane.f32.xlu1 %v84_v27  ;;  %82 = vmax.xlane.f32.xlu0 %v81_v28  ;;  %p1080_p3 = por %p1079_p2, %p1078_p1 }
  0x1d   :  { %p1081_p4 = pnand %p1080_p3, %p1074_p0 }
  0x1f   :  { %91 = vmax.xlane.f32.xlu1 %v90_v31  ;;  %88 = vmax.xlane.f32.xlu0 %v87_v32 }
  0x30   :  { %147 = vperm.xlu1 %976, %v29_v34  }
  0x34   :  { %150 = vperm.xlu1 %976, %v30_v35  }
  0x35   :  { %144 = vperm.xlu0 %975, %v28_v36  }
  0x38   :  { %153 = vperm.xlu1 %976, %v31_v37  }
  0x39   :  { %171 = vperm.xlu0 %975, %v37_v38  }
  0x3c   :  { %156 = vperm.xlu1 %976, %v32_v39  }
  0x3d   :  { %177 = vperm.xlu0 %975, %v39_v40  }
  0x40   :  { %159 = vperm.xlu1 %976, %v33_v41  }
  0x41   :  { %183 = vperm.xlu0 %975, %v41_v42  }
  0x44   :  { %162 = vperm.xlu1 %976, %v34_v43  }
  0x45   :  { %189 = vperm.xlu0 %975, %v43_v44  }
  0x48   :  { %165 = vperm.xlu1 %976, %v35_v45  }
  0x4c   :  { %168 = vperm.xlu1 %976, %v36_v46  }
  0x50   :  { %174 = vperm.xlu1 %976, %v38_v47  }
  0x54   :  { %180 = vperm.xlu1 %976, %v40_v48  }
  0x58   :  { %186 = vperm.xlu1 %976, %v42_v49  }
  0x90   :  { %v1275_v50 = vpop.xlane.xlu1 %52  ;;  %v1277_v51 = vpop.xlane.xlu0 %46 }
  0x91   :  { %v93_v52 = vsub.f32 %v1123_v1, %v1277_v51  ;;  %v95_v53 = vsub.f32 %v1118_v0, %v1275_v50 }
  0x93   :  { %v109_v54 = vmul.f32 1.442695, %v93_v52  ;;  %v113_v59 = vmul.f32 1.442695, %v95_v53 }
  0x94   :  { %v1283_v55 = vpop.xlane.xlu1 %55  ;;  %v1285_v56 = vpop.xlane.xlu0 %49 }
  0x95   :  { %v96_v57 = vsub.f32 %v1128_v2, %v1283_v55  ;;  %v94_v58 = vsub.f32 %v1137_v5, %v1285_v56  ;;  %977 = vpow2.f32 %v109_v54  ;;  %v141_v54 = vlaneseq }
  0x97   :  { %v111_v60 = vmul.f32 1.442695, %v94_v58  ;;  %v115_v63 = vmul.f32 1.442695, %v96_v57 }
  0x98   :  { %v1291_v61 = vpop.xlane.xlu1 %61  ;;  %v1293_v62 = vpop.xlane.xlu0 %58 }
  0x99   :  { %v98_v3 = vsub.f32 %v1146_v9, %v1291_v61  ;;  %v97_v4 = vsub.f32 %v1151_v10, %v1293_v62  ;;  %979 = vpow2.f32 %v111_v60 }
  0x9a   :  { %981 = vpow2.f32 %v113_v59 }
  0x9b   :  { %v117_v6 = vmul.f32 1.442695, %v97_v4  ;;  %983 = vpow2.f32 %v115_v63  ;;  %v119_v11 = vmul.f32 1.442695, %v98_v3  ;;  %v1346_v4 = vand.u32 127, %v141_v54 }
  0x9c   :  { %v1299_v7 = vpop.xlane.xlu1 %67  ;;  %v1301_v8 = vpop.xlane.xlu0 %64 }
  0x9d   :  { %v100_v12 = vsub.f32 %v1160_v13, %v1299_v7  ;;  %v99_v15 = vsub.f32 %v1165_v14, %v1301_v8  ;;  %985 = vpow2.f32 %v117_v6 }
  0x9e   :  { %987 = vpow2.f32 %v119_v11 }
  0x9f   :  { %v121_v16 = vmul.f32 1.442695, %v99_v15  ;;  %v978_v19 = vpop.eup %977  ;;  %v123_v24 = vmul.f32 1.442695, %v100_v12 }
  0xa0   :  { %v1307_v20 = vpop.xlane.xlu1 %73  ;;  %v1309_v23 = vpop.xlane.xlu0 %70  ;;  %914 = vmatprep.mubr.msk.f32.mxu0 %vm44_vm0, %v978_v19 }
  0xa1   :  { %v102_v27 = vsub.f32 %v1174_v17, %v1307_v20  ;;  %v101_v28 = vsub.f32 %v1179_v18, %v1309_v23  ;;  %989 = vpow2.f32 %v121_v16 }
  0xa2   :  { %991 = vpow2.f32 %v123_v24 }
  0xa3   :  { %v125_v31 = vmul.f32 1.442695, %v101_v28  ;;  %v980_v32 = vpop.eup %979  ;;  %v127_v36 = vmul.f32 1.442695, %v102_v27 }
  0xa4   :  { %v1316_v33 = vpop.xlane.xlu1 %79  ;;  %v1318_v34 = vpop.xlane.xlu0 %76  ;;  %915 = vmatmul.mubr.msk.f32.vlgmr.msra.gmra.mrb[0].mxu0 %vm44_vm0, %v980_v32 }
  0xa5   :  { %v982_v35 = vpop.eup %981  ;;  %v104_v37 = vsub.f32 %v1188_v21, %v1316_v33  ;;  %v103_v38 = vsub.f32 %v1193_v22, %v1318_v34  ;;  %993 = vpow2.f32 %v125_v31 }
  0xa6   :  { %917 = vmatprep.mubr.msk.f32.mxu0 %vm44_vm0, %v982_v35  ;;  %v984_v39 = vpop.eup %983  ;;  %995 = vpow2.f32 %v127_v36 }
  0xa7   :  { %v129_v40 = vmul.f32 1.442695, %v103_v38  ;;  %v986_v41 = vpop.eup %985  ;;  %v131_v44 = vmul.f32 1.442695, %v104_v37 }
  0xa8   :  { %v1326_v42 = vpop.xlane.xlu1 %85  ;;  %v1328_v43 = vpop.xlane.xlu0 %82  ;;  %918 = vmatmul.mubr.msk.f32.gmra.mrb[2].mxu0 %vm44_vm0, %v984_v39 }
  0xa9   :  { %v106_v45 = vsub.f32 %v1202_v25, %v1326_v42  ;;  %v105_v46 = vsub.f32 %v1207_v26, %v1328_v43  ;;  %997 = vpow2.f32 %v129_v40  ;;  %920 = vmatprep.mubr.msk.f32.mxu0 %vm44_vm0, %v986_v41  ;;  %v988_v47 = vpop.eup %987 }
  0xaa   :  { %999 = vpow2.f32 %v131_v44 }
  0xab   :  { %v133_v48 = vmul.f32 1.442695, %v105_v46  ;;  %v990_v49 = vpop.eup %989  ;;  %v135_v57 = vmul.f32 1.442695, %v106_v45 }
  0xac   :  { %v1336_v52 = vpop.xlane.xlu1 %91  ;;  %v1338_v53 = vpop.xlane.xlu0 %88  ;;  %921 = vmatmul.mubr.msk.f32.gmra.mrb[4].mxu0 %vm44_vm0, %v988_v47 }
  0xad   :  { %v107_v58 = vsub.f32 %v1221_v30, %v1338_v53  ;;  %1001 = vpow2.f32 %v133_v48  ;;  %v108_v59 = vsub.f32 %v1216_v29, %v1336_v52  ;;  %923 = vmatprep.mubr.msk.f32.mxu0 %vm44_vm0, %v990_v49  ;;  %v992_v60 = vpop.eup %991 }
  0xae   :  { %1003 = vpow2.f32 %v135_v57 }
  0xaf   :  { %v137_v63 = vmul.f32 1.442695, %v107_v58  ;;  %v994_v3 = vpop.eup %993  ;;  %v139_v11 = vmul.f32 1.442695, %v108_v59 }
  0xb0   :  { %v148_v6 = vpop.permute.xlu1 %147  ;;  %924 = vmatmul.mubr.msk.f32.gmra.mrb[6].mxu0 %vm44_vm0, %v992_v60  ;;  %v996_v12 = vpop.eup %995 }
  0xb1   :  { %1005 = vpow2.f32 %v137_v63  ;;  %926 = vmatprep.mubr.msk.f32.mxu0 %vm44_vm0, %v994_v3  ;;  %vm192_vm1 = vcmp.eq.s32.totalorder %v1346_v4, %v148_v6 }
  0xb2   :  { %1007 = vpow2.f32 %v139_v11  ;;  %v208_v28 = vsel %vm192_vm1, %v1137_v5, 0.0 }
  0xb3   :  { %v998_v15 = vpop.eup %997 }
  0xb4   :  { %v151_v16 = vpop.permute.xlu1 %150  ;;  %v145_v19 = vpop.permute.xlu0 %144  ;;  %927 = vmatmul.mubr.msk.f32.gmra.mrb[8].mxu0 %vm44_vm0, %v996_v12 }
  0xb5   :  { %vm193_vm2 = vcmp.eq.s32.totalorder %v1346_v4, %v151_v16  ;;  %vm191_vm3 = vcmp.eq.s32.totalorder %v1346_v4, %v145_v19  ;;  %929 = vmatprep.mubr.msk.f32.mxu0 %vm44_vm0, %v998_v15  ;;  %v1000_v27 = vpop.eup %999 }
  0xb6   :  { %v207_v24 = vsel %vm191_vm3, %v1123_v1, 0.0  ;;  %v209_v32 = vsel %vm193_vm2, %v1118_v0, 0.0 }
  0xb7   :  { %942 = vmatprep.mubr.msk.f32.mxu1 %vm44_vm0, %v207_v24  ;;  %v1002_v31 = vpop.eup %1001 }
  0xb8   :  { %v154_v35 = vpop.permute.xlu1 %153  ;;  %943 = vmatmul.mubr.msk.f32.vlgmr.msra.gmra.mrb[0].mxu1 %vm44_vm0, %v208_v28  ;;  %930 = vmatmul.mubr.msk.f32.gmra.mrb[10].mxu0 %vm44_vm0, %v1000_v27  ;;  %v1004_v1 = vpop.eup %1003 }
  0xb9   :  { %vm194_vm4 = vcmp.eq.s32.totalorder %v1346_v4, %v154_v35  ;;  %945 = vmatprep.mubr.msk.f32.mxu1 %vm44_vm0, %v209_v32  ;;  %932 = vmatprep.mubr.msk.f32.mxu0 %vm44_vm0, %v1002_v31  ;;  %v172_v40 = vpop.permute.xlu0 %171 }
  0xba   :  { %v210_v36 = vsel %vm194_vm4, %v1128_v2, 0.0  ;;  %vm200_vm9 = vcmp.eq.s32.totalorder %v1346_v4, %v172_v40 }
  0xbb   :  { %v1006_v5 = vpop.eup %1005  ;;  %v216_v48 = vsel %vm200_vm9, %v1174_v17, 0.0 }
  0xbc   :  { %v157_v37 = vpop.permute.xlu1 %156  ;;  %946 = vmatmul.mubr.msk.f32.gmra.mrb[2].mxu1 %vm44_vm0, %v210_v36  ;;  %933 = vmatmul.mubr.msk.f32.gmra.mrb[12].mxu0 %vm44_vm0, %v1004_v1  ;;  %v1008_v38 = vpop.eup %1007 }
  0xbd   :  { %vm195_vm5 = vcmp.eq.s32.totalorder %v1346_v4, %v157_v37  ;;  %935 = vmatprep.mubr.msk.f32.mxu0 %vm44_vm0, %v1006_v5  ;;  %v178_v45 = vpop.permute.xlu0 %177 }
  0xbe   :  { %v211_v0 = vsel %vm195_vm5, %v1151_v10, 0.0  ;;  %vm202_vm11 = vcmp.eq.s32.totalorder %v1346_v4, %v178_v45 }
  0xbf   :  { %948 = vmatprep.mubr.msk.f32.mxu1 %vm44_vm0, %v211_v0  ;;  %v218_v54 = vsel %vm202_vm11, %v1188_v21, 0.0 }
  0xc0   :  { %v160_v39 = vpop.permute.xlu1 %159  ;;  %936 = vmatmul.mubr.msk.f32.gmra.mrb[14].mxu0 %vm44_vm0, %v1008_v38 }
  0xc1   :  { %vm196_vm6 = vcmp.eq.s32.totalorder %v1346_v4, %v160_v39 }
  0xc2   :  { %v212_v2 = vsel %vm196_vm6, %v1146_v9, 0.0 }
  0xc3   :  { %949 = vmatmul.mubr.msk.f32.gmra.mrb[4].mxu1 %vm44_vm0, %v212_v2 }
  0xc4   :  { %v163_v41 = vpop.permute.xlu1 %162 }
  0xc5   :  { %vm197_vm7 = vcmp.eq.s32.totalorder %v1346_v4, %v163_v41 }
  0xc6   :  { %v213_v10 = vsel %vm197_vm7, %v1165_v14, 0.0  ;;  %v184_v14 = vpop.permute.xlu0 %183 }
  0xc7   :  { %951 = vmatprep.mubr.msk.f32.mxu1 %vm44_vm0, %v213_v10  ;;  %vm204_vm13 = vcmp.eq.s32.totalorder %v1346_v4, %v184_v14 }
  0xc8   :  { %v166_v44 = vpop.permute.xlu1 %165  ;;  %v220_v58 = vsel %vm204_vm13, %v1202_v25, 0.0 }
  0xc9   :  { %vm198_vm8 = vcmp.eq.s32.totalorder %v1346_v4, %v166_v44 }
  0xca   :  { %v214_v46 = vsel %vm198_vm8, %v1160_v13, 0.0  ;;  %v190_v17 = vpop.permute.xlu0 %189 }
  0xcb   :  { %952 = vmatmul.mubr.msk.f32.gmra.mrb[6].mxu1 %vm44_vm0, %v214_v46  ;;  %vm206_vm15 = vcmp.eq.s32.totalorder %v1346_v4, %v190_v17 }
  0xcc   :  { %v169_v9 = vpop.permute.xlu1 %168  ;;  %v222_v59 = vsel %vm206_vm15, %v1216_v29, 0.0 }
  0xcd   :  { %vm199_vm10 = vcmp.eq.s32.totalorder %v1346_v4, %v169_v9 }
  0xce   :  { %v215_v47 = vsel %vm199_vm10, %v1179_v18, 0.0 }
  0xcf   :  { %954 = vmatprep.mubr.msk.f32.mxu1 %vm44_vm0, %v215_v47 }
  0xd0   :  { %v175_v49 = vpop.permute.xlu1 %174  ;;  %955 = vmatmul.mubr.msk.f32.gmra.mrb[8].mxu1 %vm44_vm0, %v216_v48 }
  0xd1   :  { %vm201_vm12 = vcmp.eq.s32.totalorder %v1346_v4, %v175_v49 }
  0xd2   :  { %v217_v13 = vsel %vm201_vm12, %v1193_v22, 0.0 }
  0xd3   :  { %957 = vmatprep.mubr.msk.f32.mxu1 %vm44_vm0, %v217_v13 }
  0xd4   :  { %v181_v18 = vpop.permute.xlu1 %180  ;;  %958 = vmatmul.mubr.msk.f32.gmra.mrb[10].mxu1 %vm44_vm0, %v218_v54 }
  0xd5   :  { %vm203_vm14 = vcmp.eq.s32.totalorder %v1346_v4, %v181_v18 }
  0xd6   :  { %v219_v57 = vsel %vm203_vm14, %v1207_v26, 0.0 }
  0xd7   :  { %960 = vmatprep.mubr.msk.f32.mxu1 %vm44_vm0, %v219_v57 }
  0xd8   :  { %v187_v22 = vpop.permute.xlu1 %186  ;;  %961 = vmatmul.mubr.msk.f32.gmra.mrb[12].mxu1 %vm44_vm0, %v220_v58 }
  0xd9   :  { %vm205_vm1 = vcmp.eq.s32.totalorder %v1346_v4, %v187_v22 }
  0xda   :  { %v221_v21 = vsel %vm205_vm1, %v1221_v30, 0.0 }
  0xdb   :  { %963 = vmatprep.mubr.msk.f32.mxu1 %vm44_vm0, %v221_v21 }
  0xdc   :  { %964 = vmatmul.mubr.msk.f32.gmra.mrb[14].mxu1 %vm44_vm0, %v222_v59  ;;  %vm785_vm0 = vcmask 7168  }
 0x177   :  { %v916_v26 = vpop.f32.mrb[0].mxu0 }
 0x178   :  { %1009 = vlog2.f32 %v916_v26  ;;  %v337_v25 = vpop.f32.mrb[1].mxu0 }
 0x179   :  { %1011 = vlog2.f32 %v337_v25 }
 0x17b   :  { %v919_v60 = vpop.f32.mrb[2].mxu0 }
 0x17c   :  { %1013 = vlog2.f32 %v919_v60  ;;  %v347_v63 = vpop.f32.mrb[3].mxu0 }
 0x17d   :  { %1015 = vlog2.f32 %v347_v63 }
 0x17f   :  { %v922_v3 = vpop.f32.mrb[4].mxu0 }
 0x180   :  { %v357_v6 = vpop.f32.mrb[5].mxu0  ;;  %1017 = vlog2.f32 %v922_v3 }
 0x181   :  { %1019 = vlog2.f32 %v357_v6 }
 0x182   :  { %v1010_v11 = vpop.eup %1009 }
 0x183   :  { %v1012_v4 = vpop.eup %1011  ;;  %v925_v30 = vpop.f32.mrb[6].mxu0  ;;  %v612_v12 = vmul.f32 0.6931472, %v1010_v11 }
 0x184   :  { %v367_v29 = vpop.f32.mrb[7].mxu0  ;;  %v610_v16 = vmul.f32 0.6931472, %v1012_v4  ;;  %1021 = vlog2.f32 %v925_v30 }
 0x185   :  { %v642_v31 = vadd.f32 %v612_v12, %v1285_v56  ;;  %1023 = vlog2.f32 %v367_v29 }
 0x186   :  { %v1014_v15 = vpop.eup %1013  ;;  %v641_v36 = vadd.f32 %v610_v16, %v1277_v51 }
 0x187   :  { %v1016_v19 = vpop.eup %1015  ;;  %v928_v24 = vpop.f32.mrb[8].mxu0  ;;  %v616_v28 = vmul.f32 0.6931472, %v1014_v15 }
 0x188   :  { %v377_v27 = vpop.f32.mrb[9].mxu0  ;;  %v614_v32 = vmul.f32 0.6931472, %v1016_v19  ;;  %1025 = vlog2.f32 %v928_v24 }
 0x189   :  { %1027 = vlog2.f32 %v377_v27  ;;  %v644_v56 = vadd.f32 %v616_v28, %v1283_v55 }
 0x18a   :  { %v1018_v39 = vpop.eup %1017  ;;  %v643_v10 = vadd.f32 %v614_v32, %v1275_v50 }
 0x18b   :  { %v944_v35 = vpop.f32.mrb[0].mxu1  ;;  %v931_v1 = vpop.f32.mrb[10].mxu0  ;;  %v620_v47 = vmul.f32 0.6931472, %v1018_v39 }
 0x18c   :  { %v1407_v5 = vsub.f32 %v642_v31, %v944_v35  ;;  %v530_v37 = vpop.f32.mrb[1].mxu1  ;;  %v387_v0 = vpop.f32.mrb[11].mxu0  ;;  %1029 = vlog2.f32 %v931_v1 }
 0x18d   :  { %v1409_v38 = vsub.f32 %v641_v36, %v530_v37  ;;  %v1020_v40 = vpop.eup %1019  ;;  %1031 = vlog2.f32 %v387_v0  ;;  %v646_v21 = vadd.f32 %v620_v47, %v1291_v61 }
 0x18e   :  { %v674_v2 = vsub.f32 0.0, %v1407_v5  ;;  %v618_v13 = vmul.f32 0.6931472, %v1020_v40  ;;  %v1022_v18 = vpop.eup %1021 }
 0x18f   :  { %v673_v41 = vsub.f32 0.0, %v1409_v38  ;;  %v947_v51 = vpop.f32.mrb[2].mxu1  ;;  %v934_v45 = vpop.f32.mrb[12].mxu0  ;;  %v624_v30 = vmul.f32 0.6931472, %v1022_v18 }
 0x190   :  { %v691_v44 = vmul.f32 1.442695, %v674_v2  ;;  %v1415_v46 = vsub.f32 %v644_v56, %v947_v51  ;;  %v540_v9 = vpop.f32.mrb[3].mxu1  ;;  %1033 = vlog2.f32 %v934_v45  ;;  %v397_v14 = vpop.f32.mrb[13].mxu0  ;;  %v645_v25 = vadd.f32 %v618_v13, %v1293_v62 }
 0x191   :  { %v689_v48 = vmul.f32 1.442695, %v673_v41  ;;  %v1417_v49 = vsub.f32 %v643_v10, %v540_v9  ;;  %v1024_v57 = vpop.eup %1023  ;;  %v648_v1 = vadd.f32 %v624_v30, %v1299_v7 }
 0x192   :  { %1035 = vpow2.f32 %v691_v44  ;;  %v676_v55 = vsub.f32 0.0, %v1415_v46  ;;  %v1026_v59 = vpop.eup %1025  ;;  %v622_v12 = vmul.f32 0.6931472, %v1024_v57 }
 0x193   :  { %1037 = vpow2.f32 %v689_v48  ;;  %v675_v54 = vsub.f32 0.0, %v1417_v49  ;;  %v937_v17 = vpop.f32.mrb[14].mxu0  ;;  %v1028_v60 = vpop.eup %1027  ;;  %v628_v16 = vmul.f32 0.6931472, %v1026_v59 }
 0x194   :  { %v695_v50 = vmul.f32 1.442695, %v676_v55  ;;  %1039 = vlog2.f32 %v397_v14  ;;  %v407_v22 = vpop.f32.mrb[15].mxu0  ;;  %v626_v19 = vmul.f32 0.6931472, %v1028_v60  ;;  %v647_v2 = vadd.f32 %v622_v12, %v1301_v8 }
 0x195   :  { %v693_v58 = vmul.f32 1.442695, %v675_v54  ;;  %1041 = vlog2.f32 %v937_v17  ;;  %v650_v10 = vadd.f32 %v628_v16, %v1307_v20 }
 0x196   :  { %1043 = vpow2.f32 %v695_v50  ;;  %v950_v26 = vpop.f32.mrb[4].mxu1  ;;  %v1030_v6 = vpop.eup %1029  ;;  %v649_v44 = vadd.f32 %v626_v19, %v1309_v23 }
 0x197   :  { %1045 = vpow2.f32 %v693_v58  ;;  %v1423_v63 = vsub.f32 %v646_v21, %v950_v26  ;;  %v550_v3 = vpop.f32.mrb[5].mxu1  ;;  %v1032_v4 = vpop.eup %1031  ;;  %v632_v27 = vmul.f32 0.6931472, %v1030_v6 }
 0x198   :  { %v1425_v11 = vsub.f32 %v645_v25, %v550_v3  ;;  %v630_v28 = vmul.f32 0.6931472, %v1032_v4  ;;  %1047 = vlog2.f32 %v407_v22 }
 0x199   :  { %v678_v29 = vsub.f32 0.0, %v1423_v63  ;;  %v652_v7 = vadd.f32 %v632_v27, %v1316_v33 }
 0x19a   :  { %v677_v61 = vsub.f32 0.0, %v1425_v11  ;;  %v1034_v15 = vpop.eup %1033  ;;  %v651_v48 = vadd.f32 %v630_v28, %v1318_v34 }
 0x19b   :  { %v699_v24 = vmul.f32 1.442695, %v678_v29  ;;  %v636_v36 = vmul.f32 0.6931472, %v1034_v15 }
 0x19c   :  { %v1036_v62 = vpop.eup %1035  ;;  %v697_v31 = vmul.f32 1.442695, %v677_v61 }
 0x19d   :  { %v1038_v32 = vpop.eup %1037  ;;  %v722_v35 = vsub.f32 1.0, %v1036_v62  ;;  %1049 = vpow2.f32 %v699_v24  ;;  %v654_v54 = vadd.f32 %v636_v36, %v1326_v42 }
 0x19e   :  { %v1040_v37 = vpop.eup %1039  ;;  %v721_v0 = vsub.f32 1.0, %v1038_v32  ;;  %1051 = vpow2.f32 %v697_v31  ;;  %v953_v39 = vpop.f32.mrb[6].mxu1 }
 0x19f   :  { %v1042_v56 = vpop.eup %1041  ;;  %v738_v40 = vmul.f32 %v722_v35, %v722_v35  ;;  %v1431_v41 = vsub.f32 %v648_v1, %v953_v39  ;;  %v560_v51 = vpop.f32.mrb[7].mxu1  ;;  %v634_v50 = vmul.f32 0.6931472, %v1040_v37 }
 0x1a0   :  { %v1044_v45 = vpop.eup %1043  ;;  %v737_v9 = vmul.f32 %v721_v0, %v721_v0  ;;  %v1435_v47 = vsub.f32 %v647_v2, %v560_v51  ;;  %v640_v58 = vmul.f32 0.6931472, %v1042_v56 }
 0x1a1   :  { %v1046_v14 = vpop.eup %1045  ;;  %v754_v13 = vmul.f32 0.25, %v738_v40  ;;  %v724_v8 = vsub.f32 1.0, %v1044_v45  ;;  %v680_v55 = vsub.f32 0.0, %v1431_v41  ;;  %v653_v16 = vadd.f32 %v634_v50, %v1328_v43 }
 0x1a2   :  { %v753_v18 = vmul.f32 0.25, %v737_v9  ;;  %v723_v20 = vsub.f32 1.0, %v1046_v14  ;;  %v679_v23 = vsub.f32 0.0, %v1435_v47  ;;  %v1048_v6 = vpop.eup %1047 }
 0x1a3   :  { %v770_v17 = vmul.f32 %v754_v13, %v1407_v5  ;;  %v740_v57 = vmul.f32 %v724_v8, %v724_v8  ;;  %v703_v22 = vmul.f32 1.442695, %v680_v55  ;;  %v956_v33 = vpop.f32.mrb[8].mxu1  ;;  %v638_v32 = vmul.f32 0.6931472, %v1048_v6 }
 0x1a4   :  { %v769_v34 = vmul.f32 %v753_v18, %v1409_v38  ;;  %v739_v21 = vmul.f32 %v723_v20, %v723_v20  ;;  %v701_v59 = vmul.f32 1.442695, %v679_v23  ;;  %v1444_v26 = vsub.f32 %v650_v10, %v956_v33  ;;  %v570_v25 = vpop.f32.mrb[9].mxu1 }
 0x1a5   :  { %v787_v42 = vsel %vm785_vm0, %v770_v17, 0.0  ;;  %v756_v60 = vmul.f32 0.25, %v740_v57  ;;  %1053 = vpow2.f32 %v703_v22  ;;  %v1447_v3 = vsub.f32 %v649_v44, %v570_v25 }
 0x1a6   :  { %v786_v5 = vsel %vm785_vm0, %v769_v34, 0.0  ;;  %v755_v4 = vmul.f32 0.25, %v739_v21  ;;  %1055 = vpow2.f32 %v701_v59  ;;  %v682_v30 = vsub.f32 0.0, %v1444_v26 }
 0x1a7   :  { %v1050_v29 = vpop.eup %1049  ;;  %v788_v38 = vadd.f32 %v787_v42, %v786_v5  ;;  %v772_v12 = vmul.f32 %v756_v60, %v1415_v46  ;;  %v681_v61 = vsub.f32 0.0, %v1447_v3  ;;  %v959_v15 = vpop.f32.mrb[10].mxu1  ;;  %v656_v13 = vadd.f32 %v640_v58, %v1336_v52 }
 0x1a8   :  { %v1052_v19 = vpop.eup %1051  ;;  %v771_v24 = vmul.f32 %v755_v4, %v1417_v49  ;;  %v726_v62 = vsub.f32 1.0, %v1050_v29  ;;  %v707_v27 = vmul.f32 1.442695, %v682_v30  ;;  %v1455_v28 = vsub.f32 %v652_v7, %v959_v15  ;;  %v580_v31 = vpop.f32.mrb[11].mxu1 }
 0x1a9   :  { %v725_v35 = vsub.f32 1.0, %v1052_v19  ;;  %v705_v36 = vmul.f32 1.442695, %v681_v61  ;;  %v1457_v1 = vsub.f32 %v651_v48, %v580_v31  ;;  %v791_v56 = vsel %vm785_vm0, %v772_v12, 0.0 }
 0x1aa   :  { %v789_v46 = vsel %vm785_vm0, %v771_v24, 0.0  ;;  %v742_v37 = vmul.f32 %v726_v62, %v726_v62  ;;  %1057 = vpow2.f32 %v707_v27  ;;  %v684_v0 = vsub.f32 0.0, %v1455_v28 }
 0x1ab   :  { %v790_v43 = vadd.f32 %v789_v46, %v788_v38  ;;  %v741_v39 = vmul.f32 %v725_v35, %v725_v35  ;;  %1059 = vpow2.f32 %v705_v36  ;;  %v683_v49 = vsub.f32 0.0, %v1457_v1  ;;  %v962_v2 = vpop.f32.mrb[12].mxu1 }
 0x1ac   :  { %v758_v40 = vmul.f32 0.25, %v742_v37  ;;  %v711_v51 = vmul.f32 1.442695, %v684_v0  ;;  %v1463_v10 = vsub.f32 %v654_v54, %v962_v2  ;;  %v590_v44 = vpop.f32.mrb[13].mxu1  ;;  %v655_v8 = vadd.f32 %v638_v32, %v1338_v53 }
 0x1ad   :  { %v757_v45 = vmul.f32 0.25, %v741_v39  ;;  %v792_v9 = vadd.f32 %v791_v56, %v790_v43  ;;  %v709_v7 = vmul.f32 1.442695, %v683_v49  ;;  %v1465_v48 = vsub.f32 %v653_v16, %v590_v44 }
 0x1ae   :  { %1061 = vpow2.f32 %v711_v51  ;;  %v686_v14 = vsub.f32 0.0, %v1463_v10  ;;  %v774_v18 = vmul.f32 %v758_v40, %v1423_v63 }
 0x1af   :  { %v1054_v55 = vpop.eup %1053  ;;  %v773_v50 = vmul.f32 %v757_v45, %v1425_v11  ;;  %1063 = vpow2.f32 %v709_v7  ;;  %v685_v54 = vsub.f32 0.0, %v1465_v48  ;;  %v965_v20 = vpop.f32.mrb[14].mxu1 }
 0x1b0   :  { %v1056_v23 = vpop.eup %1055  ;;  %v728_v17 = vsub.f32 1.0, %v1054_v55  ;;  %v715_v57 = vmul.f32 1.442695, %v686_v14  ;;  %v1473_v22 = vsub.f32 %v656_v13, %v965_v20  ;;  %v600_v33 = vpop.f32.mrb[15].mxu1  ;;  %v795_v59 = vsel %vm785_vm0, %v774_v18, 0.0 }
 0x1b1   :  { %v793_v34 = vsel %vm785_vm0, %v773_v50, 0.0  ;;  %v727_v52 = vsub.f32 1.0, %v1056_v23  ;;  %v713_v58 = vmul.f32 1.442695, %v685_v54  ;;  %v1476_v53 = vsub.f32 %v655_v8, %v600_v33 }
 0x1b2   :  { %v794_v21 = vadd.f32 %v793_v34, %v792_v9  ;;  %v744_v63 = vmul.f32 %v728_v17, %v728_v17  ;;  %1065 = vpow2.f32 %v715_v57  ;;  %v688_v11 = vsub.f32 0.0, %v1473_v22 }
 0x1b3   :  { %v743_v25 = vmul.f32 %v727_v52, %v727_v52  ;;  %1067 = vpow2.f32 %v713_v58  ;;  %v687_v42 = vsub.f32 0.0, %v1476_v53 }
 0x1b4   :  { %v1058_v60 = vpop.eup %1057  ;;  %v760_v6 = vmul.f32 0.25, %v744_v63  ;;  %v796_v5 = vadd.f32 %v795_v59, %v794_v21  ;;  %v719_v4 = vmul.f32 1.442695, %v688_v11 }
 0x1b5   :  { %v1060_v30 = vpop.eup %1059  ;;  %v759_v29 = vmul.f32 0.25, %v743_v25  ;;  %v730_v38 = vsub.f32 1.0, %v1058_v60  ;;  %v717_v12 = vmul.f32 1.442695, %v687_v42 }
 0x1b6   :  { %v729_v61 = vsub.f32 1.0, %v1060_v30  ;;  %1069 = vpow2.f32 %v719_v4  ;;  %v776_v15 = vmul.f32 %v760_v6, %v1431_v41 }
 0x1b7   :  { %v775_v16 = vmul.f32 %v759_v29, %v1435_v47  ;;  %v746_v19 = vmul.f32 %v730_v38, %v730_v38  ;;  %1071 = vpow2.f32 %v717_v12 }
 0x1b8   :  { %v1062_v24 = vpop.eup %1061  ;;  %v745_v62 = vmul.f32 %v729_v61, %v729_v61  ;;  %v799_v0 = vsel %vm785_vm0, %v776_v15, 0.0 }
 0x1b9   :  { %v1064_v27 = vpop.eup %1063  ;;  %v797_v31 = vsel %vm785_vm0, %v775_v16, 0.0  ;;  %v762_v32 = vmul.f32 0.25, %v746_v19  ;;  %v732_v35 = vsub.f32 1.0, %v1062_v24 }
 0x1ba   :  { %v798_v36 = vadd.f32 %v797_v31, %v796_v5  ;;  %v761_v46 = vmul.f32 0.25, %v745_v62  ;;  %v731_v37 = vsub.f32 1.0, %v1064_v27 }
 0x1bb   :  { %v748_v43 = vmul.f32 %v732_v35, %v732_v35  ;;  %v778_v41 = vmul.f32 %v762_v32, %v1444_v26 }
 0x1bc   :  { %v1066_v39 = vpop.eup %1065  ;;  %v777_v47 = vmul.f32 %v761_v46, %v1447_v3  ;;  %v800_v49 = vadd.f32 %v799_v0, %v798_v36  ;;  %v747_v2 = vmul.f32 %v731_v37, %v731_v37 }
 0x1bd   :  { %v1068_v56 = vpop.eup %1067  ;;  %v764_v40 = vmul.f32 0.25, %v748_v43  ;;  %v734_v51 = vsub.f32 1.0, %v1066_v39  ;;  %v803_v8 = vsel %vm785_vm0, %v778_v41, 0.0 }
 0x1be   :  { %v801_v44 = vsel %vm785_vm0, %v777_v47, 0.0  ;;  %v763_v45 = vmul.f32 0.25, %v747_v2  ;;  %v733_v9 = vsub.f32 1.0, %v1068_v56 }
 0x1bf   :  { %v802_v7 = vadd.f32 %v801_v44, %v800_v49  ;;  %v750_v14 = vmul.f32 %v734_v51, %v734_v51  ;;  %v780_v55 = vmul.f32 %v764_v40, %v1455_v28 }
 0x1c0   :  { %v1070_v13 = vpop.eup %1069  ;;  %v779_v26 = vmul.f32 %v763_v45, %v1457_v1  ;;  %v749_v18 = vmul.f32 %v733_v9, %v733_v9 }
 0x1c1   :  { %v1072_v3 = vpop.eup %1071  ;;  %v804_v50 = vadd.f32 %v803_v8, %v802_v7  ;;  %v766_v54 = vmul.f32 0.25, %v750_v14  ;;  %v736_v20 = vsub.f32 1.0, %v1070_v13  ;;  %v807_v52 = vsel %vm785_vm0, %v780_v55, 0.0 }
 0x1c2   :  { %v805_v23 = vsel %vm785_vm0, %v779_v26, 0.0  ;;  %v765_v17 = vmul.f32 0.25, %v749_v18  ;;  %v735_v57 = vsub.f32 1.0, %v1072_v3 }
 0x1c3   :  { %v806_v33 = vadd.f32 %v805_v23, %v804_v50  ;;  %v752_v34 = vmul.f32 %v736_v20, %v736_v20  ;;  %v782_v58 = vmul.f32 %v766_v54, %v1463_v10 }
 0x1c4   :  { %v781_v21 = vmul.f32 %v765_v17, %v1465_v48  ;;  %v751_v28 = vmul.f32 %v735_v57, %v735_v57 }
 0x1c5   :  { %v808_v63 = vadd.f32 %v807_v52, %v806_v33  ;;  %v768_v1 = vmul.f32 0.25, %v752_v34  ;;  %v811_v42 = vsel %vm785_vm0, %v782_v58, 0.0 }
 0x1c6   :  { %v809_v11 = vsel %vm785_vm0, %v781_v21, 0.0  ;;  %v767_v59 = vmul.f32 0.25, %v751_v28 }
 0x1c7   :  { %v810_v25 = vadd.f32 %v809_v11, %v808_v63  ;;  %v784_v60 = vmul.f32 %v768_v1, %v1473_v22 }
 0x1c8   :  { %v783_v6 = vmul.f32 %v767_v59, %v1476_v53 }
 0x1c9   :  { %v812_v5 = vadd.f32 %v811_v42, %v810_v25  ;;  %v815_v10 = vsel %vm785_vm0, %v784_v60, 0.0 }
 0x1ca   :  { %v813_v4 = vsel %vm785_vm0, %v783_v6, 0.0 }
 0x1cb   :  { %v814_v30 = vadd.f32 %v813_v4, %v812_v5 }
 0x1cd   :  { %v816_v48 = vadd.f32 %v815_v10, %v814_v30 }
 0x1cf   :  { %817 = vadd.xlane.f32.xlu1 %v816_v48 }
 0x25c   :  { %v818_v29 = vpop.xlane.xlu1 %817 }
 0x25d   :  { %v819_v38 = vrot.slane %v818_v29, 4 }
 0x25f   :  { %v820_v12 = vadd.f32 %v819_v38, %v818_v29 }
 0x261   :  { %v821_v61 = vrot.slane %v820_v12, 2 }
 0x263   :  { %v822_v15 = vadd.f32 %v821_v61, %v820_v12 }
 0x265   :  { %v823_v16 = vrot.slane %v822_v15, 1 }
 0x267   :  { %v824_v19 = vadd.f32 %v823_v16, %v822_v15 }
 0x269   :  { %970 = vpush %v824_v19 }
 0x29a   :  { %s971_s16 = spop %970 }
 0x29b   :  { %v826_v22 = vstv %s971_s16 }
 0x29c   :  { %827 = vst [vmem:[#allocation2] sm:$0x1] %v826_v22 }
 0x29d   :  { %1084 = shalt.err (!%p1081_p4)
}
 0x29e   :  { %s1085_s21 = scalar_lea.hbm %s1515_s2, 16 }
 0x29f   :  { %p1086_p5 = scmp.ne.s32.totalorder %s1515_s2, %s1085_s21  ;;  %p1089_p6 = scmp.lt.u32.totalorder %s1085_s21, %s1515_s2 }
 0x2a1   :  { %p1091_p7 = pnand %p1089_p6, %p1086_p5 }
 0x2a3   :  { %1094 = shalt.err (!%p1091_p7)
}
 0x2a4   :  { %837 = dma.vmem_to_hbm [thread:$0]  %s835_s15, 16, %s1515_s2, [#allocation3]  }
 0x2a5   :  { %1095 = dma.done.wait [#allocation3], 16  }
 0x2a6   :  { %1096 = vsyncadd [#allocation3], 4294967280 }
 0x2a7   :  { %841 = vsyncpa [#allocation3], 1 }

</bundles_post_ra>
